<compile_context>
chip_gen: v5e
topology: v5e:2x2
jax: 0.10.0
libtpu: 0.0.40
codegen_flags: <defaults>
</compile_context>

<pallas_src>
import functools

import jax
import jax.numpy as jnp
from jax import lax
from jax.experimental import pallas as pl
from jax.experimental.pallas import tpu as pltpu


# ----------------------------- Pallas kernel -------------------------------- #
def _lstm_lm_kernel(tok_ref, recw_ref, headw_ref, h0_ref, c0_ref,
                    out_ref, hn_ref, cn_ref):
    """Whole forward pass in a single invocation.

    tok_ref  : (B*T, 1) int32  token ids, batch-first row order
    recw_ref : (V+H+1, 4H)     [ embedding @ W_ih^T ; W_hh^T ; b_ih+b_hh ]
    headw_ref: (H+1, V)        [ W_lr^T ; b_lr ]
    h0/c0    : (B, H)          initial hidden/cell state
    out_ref  : (B*T, V)        per-step log-softmax, batch-first row order
    hn/cn    : (B, H)          final hidden/cell state
    """
    B, H = h0_ref.shape
    BT = tok_ref.shape[0]
    T = BT // B
    V = out_ref.shape[1]

    # Static views into the coalesced weight groups (all row offsets are
    # multiples of 8 -> aligned sublane slices).
    e2g = recw_ref[0:V, :]                   # (V, 4H) = embedding @ W_ih^T
    whh = recw_ref[V:V + H, :]               # (H, 4H) = W_hh^T
    bias = recw_ref[V + H:V + H + 1, :]      # (1, 4H) = b_ih + b_hh

    # (1) Fused embedding gather + input projection for ALL timesteps:
    #     one_hot(tokens) @ (E @ W_ih^T)  ==  E[tokens] @ W_ih^T   (bit-exact).
    tok = tok_ref[...]                                            # (B*T, 1) int32
    vocab_iota = lax.broadcasted_iota(jnp.int32, (BT, V), 1)
    onehot = (vocab_iota == tok).astype(jnp.float32)              # (B*T, V)
    gx = jnp.dot(onehot, e2g, preferred_element_type=jnp.float32) + bias   # (B*T, 4H)

    # Regroup the batch-first gx rows into per-timestep (B, 4H) tiles.  These
    # extracts do not depend on h, so the scheduler hoists them off the serial
    # recurrence chain.
    gx_t = [jnp.concatenate(
                [gx[b * T + t:b * T + t + 1, :] for b in range(B)], axis=0)
            for t in range(T)]

    h = h0_ref[...]                                               # (B, H) f32
    c = c0_ref[...]                                               # (B, H) f32

    # (2) Recurrence: only h @ W_hh^T is truly serial.  Fully unrolled; h/c
    #     and the h_t history live in vregs.
    # TODO(synk): hold W_hh resident in the MXU weight registers across the 8
    # steps (pltpu.matmul_push_rhs / matmul_acc_lhs / matmul_pop, MRB
    # accumulate on v7x); skipped to keep the kernel portable and obviously
    # correct.
    hs = []
    for t in range(T):
        gates = gx_t[t] + jnp.dot(h, whh,
                                  preferred_element_type=jnp.float32)   # (B, 4H)
        sig = jax.nn.sigmoid(gates)          # one full-width EUP pass
        th = jnp.tanh(gates)                 # one full-width EUP pass
        i_g = sig[:, 0 * H:1 * H]
        f_g = sig[:, 1 * H:2 * H]
        g_g = th[:, 2 * H:3 * H]
        o_g = sig[:, 3 * H:4 * H]
        c = f_g * c + i_g * g_g
        h = o_g * jnp.tanh(c)
        hs.append(h)

    # (3) Final hidden state written exactly once (not per step).
    hn_ref[...] = h.astype(hn_ref.dtype)
    cn_ref[...] = c.astype(cn_ref.dtype)

    # F.dropout with p=0.0 is the identity -> nothing to do here.

    # (4) Batch-first sublane permute of the history (in vregs), hoisted
    #     classifier head + log_softmax, ONE dense (B*T, V)=(16,128) store.
    h_all = jnp.concatenate(
        [hs[t][b:b + 1, :] for b in range(B) for t in range(T)], axis=0)  # (B*T, H)

    wlr = headw_ref[0:H, :]                  # (H, V) = W_lr^T
    blr = headw_ref[H:H + 1, :]              # (1, V)
    logits = jnp.dot(h_all, wlr, preferred_element_type=jnp.float32) + blr  # (B*T, V)
    m = jnp.max(logits, axis=-1, keepdims=True)
    lse = jnp.log(jnp.sum(jnp.exp(logits - m), axis=-1, keepdims=True)) + m
    out_ref[...] = (logits - lse).astype(out_ref.dtype)


# ------------------------------ host wrappers -------------------------------- #
def prepare_params(params):
    """One-time parameter transform (outside the per-call hot path)."""
    emb = params["embedding"]            # (V, E)
    w_ih = params["w_ih"]                # (4H, E)
    w_hh = params["w_hh"]                # (4H, H)
    b_ih = params["b_ih"]                # (4H,)
    b_hh = params["b_hh"]                # (4H,)
    w_lr = params["w_lr"]                # (V, H)
    b_lr = params["b_lr"]                # (V,)

    e2g = jnp.dot(emb, w_ih.T, precision=lax.Precision.HIGHEST)      # (V, 4H)
    rec_w = jnp.concatenate(
        [e2g, w_hh.T, (b_ih + b_hh)[None, :]], axis=0)                # (V+H+1, 4H)
    head_w = jnp.concatenate([w_lr.T, b_lr[None, :]], axis=0)         # (H+1, V)
    return {"rec_w": rec_w, "head_w": head_w}


def lstm_lm_forward(token_ids, hidden, prep):
    """Pallas implementation of Model.forward.

    token_ids : (B, T) int32
    hidden    : tuple (h0, c0), each (1, B, H)
    returns   : (log_probs (B*T, V), (h_n, c_n))
    """
    rec_w = prep["rec_w"]
    head_w = prep["head_w"]
    h0, c0 = hidden
    B, T = token_ids.shape
    H = rec_w.shape[1] // 4
    V = head_w.shape[1]

    # Batch-first token column: a free reshape, no transpose / gather glue.
    tok = token_ids.reshape(B * T, 1).astype(jnp.int32)

    vmem = pltpu.MemorySpace.VMEM
    out, h_n, c_n = pl.pallas_call(
        _lstm_lm_kernel,
        out_shape=(
            jax.ShapeDtypeStruct((B * T, V), jnp.float32),   # log-softmax, batch-first
            jax.ShapeDtypeStruct((B, H), jnp.float32),       # h_n
            jax.ShapeDtypeStruct((B, H), jnp.float32),       # c_n
        ),
        in_specs=[pl.BlockSpec(memory_space=vmem) for _ in range(5)],
        out_specs=(
            pl.BlockSpec(memory_space=vmem),
            pl.BlockSpec(memory_space=vmem),
            pl.BlockSpec(memory_space=vmem),
        ),
    )(tok, rec_w, head_w, h0[0], c0[0])

    return out, (h_n[None, ...], c_n[None, ...])


# ------------------------- pure-JAX reference ------------------------------- #
def reference_forward(token_ids, hidden, params):
    emb = params["embedding"]
    w_ih, w_hh = params["w_ih"], params["w_hh"]
    b_ih, b_hh = params["b_ih"], params["b_hh"]
    w_lr, b_lr = params["w_lr"], params["b_lr"]
    h0, c0 = hidden
    B, T = token_ids.shape
    H = w_hh.shape[1]

    x = jnp.take(emb, token_ids, axis=0)             # (B, T, E)
    x_tbe = jnp.transpose(x, (1, 0, 2))              # (T, B, E)

    def step(carry, x_t):
        h, c = carry
        gates = x_t @ w_ih.T + h @ w_hh.T + b_ih + b_hh
        i, f, g, o = jnp.split(gates, 4, axis=-1)
        i, f, o = jax.nn.sigmoid(i), jax.nn.sigmoid(f), jax.nn.sigmoid(o)
        g = jnp.tanh(g)
        c = f * c + i * g
        h = o * jnp.tanh(c)
        return (h, c), h

    (h_n, c_n), hs = lax.scan(step, (h0[0], c0[0]), x_tbe)   # hs: (T, B, H)
    lstm_out = jnp.transpose(hs, (1, 0, 2)).reshape(B * T, H)
    logits = lstm_out @ w_lr.T + b_lr
    return jax.nn.log_softmax(logits, axis=-1), (h_n[None], c_n[None])


# --------------------------------- main -------------------------------------- #
if __name__ == "__main__":
    # Model hyperparameters (args of the PyTorch module):
    #   vocab_size=128, embed_dim=32, hidden_size=32, lstm_layers=1,
    #   bidirectional=False, dropout=0.0
    VOCAB = 128
    EMBED = 32
    HIDDEN = 32
    B, T = 2, 8

    key = jax.random.PRNGKey(0)
    k_emb, k_wih, k_whh, k_bih, k_bhh, k_wlr, k_tok = jax.random.split(key, 7)

    scope = 0.1
    k_lstm = 1.0 / jnp.sqrt(HIDDEN)
    params = {
        # _init_weights: embedding and lr weight ~ U(-0.1, 0.1), lr bias = 0
        "embedding": jax.random.uniform(k_emb, (VOCAB, EMBED), jnp.float32, -scope, scope),
        "w_lr": jax.random.uniform(k_wlr, (VOCAB, HIDDEN), jnp.float32, -scope, scope),
        "b_lr": jnp.zeros((VOCAB,), jnp.float32),
        # nn.LSTM default init ~ U(-1/sqrt(H), 1/sqrt(H))
        "w_ih": jax.random.uniform(k_wih, (4 * HIDDEN, EMBED), jnp.float32, -k_lstm, k_lstm),
        "w_hh": jax.random.uniform(k_whh, (4 * HIDDEN, HIDDEN), jnp.float32, -k_lstm, k_lstm),
        "b_ih": jax.random.uniform(k_bih, (4 * HIDDEN,), jnp.float32, -k_lstm, k_lstm),
        "b_hh": jax.random.uniform(k_bhh, (4 * HIDDEN,), jnp.float32, -k_lstm, k_lstm),
    }

    token_ids = jax.random.randint(k_tok, (B, T), 0, VOCAB, dtype=jnp.int32)
    # init_hidden(bsz): zeros of shape (num_layers * num_directions, B, H)
    hidden0 = (jnp.zeros((1, B, HIDDEN), jnp.float32),
               jnp.zeros((1, B, HIDDEN), jnp.float32))

    prep = prepare_params(params)                      # one-time weight transform
    fwd = jax.jit(functools.partial(lstm_lm_forward, prep=prep))

    log_probs, (h_n, c_n) = fwd(token_ids, hidden0)
    jax.block_until_ready((log_probs, h_n, c_n))

    ref_lp, (ref_h, ref_c) = reference_forward(token_ids, hidden0, params)
    assert log_probs.shape == (B * T, VOCAB)
    assert h_n.shape == (1, B, HIDDEN) and c_n.shape == (1, B, HIDDEN)
    assert jnp.allclose(log_probs, ref_lp, atol=1e-4, rtol=1e-4)
    assert jnp.allclose(h_n, ref_h, atol=1e-5, rtol=1e-5)
    assert jnp.allclose(c_n, ref_c, atol=1e-5, rtol=1e-5)

    print("KERNEL_OK")
</pallas_src>

<mosaic_0001>
module attributes {stable_mosaic.version = 11 : i64} {
  func.func @_lstm_lm_kernel(%arg0: memref<16x1xi32, #tpu.memory_space<vmem>>, %arg1: memref<161x128xf32, #tpu.memory_space<vmem>>, %arg2: memref<33x128xf32, #tpu.memory_space<vmem>>, %arg3: memref<2x32xf32, #tpu.memory_space<vmem>>, %arg4: memref<2x32xf32, #tpu.memory_space<vmem>>, %arg5: memref<16x128xf32, #tpu.memory_space<vmem>>, %arg6: memref<2x32xf32, #tpu.memory_space<vmem>>, %arg7: memref<2x32xf32, #tpu.memory_space<vmem>>) attributes {dimension_semantics = [], scalar_prefetch = 0 : i64, scratch_operands = 0 : i64, tpu.core_type = #tpu.core_type<tc>} {
    %c0 = arith.constant 0 : index
    %c0_0 = arith.constant 0 : index
    %0 = vector.load %arg1[%c0, %c0_0] : memref<161x128xf32, #tpu.memory_space<vmem>>, vector<128x128xf32>
    %c128 = arith.constant 128 : index
    %c0_1 = arith.constant 0 : index
    %1 = vector.load %arg1[%c128, %c0_1] : memref<161x128xf32, #tpu.memory_space<vmem>>, vector<32x128xf32>
    %c160 = arith.constant 160 : index
    %c0_2 = arith.constant 0 : index
    %2 = vector.load %arg1[%c160, %c0_2] : memref<161x128xf32, #tpu.memory_space<vmem>>, vector<1x128xf32>
    %c0_3 = arith.constant 0 : index
    %c0_4 = arith.constant 0 : index
    %3 = vector.load %arg0[%c0_3, %c0_4] : memref<16x1xi32, #tpu.memory_space<vmem>>, vector<16x1xi32>
    %4 = tpu.iota {dimensions = array<i32: 1>} : vector<16x128xi32>
    %5 = vector.broadcast %3 : vector<16x1xi32> to vector<16x128xi32>
    %6 = arith.cmpi eq, %4, %5 : vector<16x128xi32>
    %7 = arith.extui %6 : vector<16x128xi1> to vector<16x128xi32>
    %8 = arith.sitofp %7 : vector<16x128xi32> to vector<16x128xf32>
    %cst = arith.constant dense<0.000000e+00> : vector<16x128xf32>
    %9 = tpu.matmul %8, %0, %cst {dimension_numbers = #tpu.dot_dimension_numbers<[1], [0], [0], [1], [0, 0, 1, 1], [], []>} : vector<16x128xf32>, vector<128x128xf32>, vector<16x128xf32> -> vector<16x128xf32>
    %10 = vector.broadcast %2 : vector<1x128xf32> to vector<16x128xf32>
    %11 = arith.addf %9, %10 : vector<16x128xf32>
    %12 = vector.extract_strided_slice %11 {offsets = [0, 0], sizes = [1, 128], strides = [1, 1]} : vector<16x128xf32> to vector<1x128xf32>
    %13 = vector.extract_strided_slice %11 {offsets = [8, 0], sizes = [1, 128], strides = [1, 1]} : vector<16x128xf32> to vector<1x128xf32>
    %14 = tpu.concatenate %12, %13 in 0 : vector<1x128xf32>, vector<1x128xf32> -> vector<2x128xf32>
    %15 = vector.extract_strided_slice %11 {offsets = [1, 0], sizes = [1, 128], strides = [1, 1]} : vector<16x128xf32> to vector<1x128xf32>
    %16 = vector.extract_strided_slice %11 {offsets = [9, 0], sizes = [1, 128], strides = [1, 1]} : vector<16x128xf32> to vector<1x128xf32>
    %17 = tpu.concatenate %15, %16 in 0 : vector<1x128xf32>, vector<1x128xf32> -> vector<2x128xf32>
    %18 = vector.extract_strided_slice %11 {offsets = [2, 0], sizes = [1, 128], strides = [1, 1]} : vector<16x128xf32> to vector<1x128xf32>
    %19 = vector.extract_strided_slice %11 {offsets = [10, 0], sizes = [1, 128], strides = [1, 1]} : vector<16x128xf32> to vector<1x128xf32>
    %20 = tpu.concatenate %18, %19 in 0 : vector<1x128xf32>, vector<1x128xf32> -> vector<2x128xf32>
    %21 = vector.extract_strided_slice %11 {offsets = [3, 0], sizes = [1, 128], strides = [1, 1]} : vector<16x128xf32> to vector<1x128xf32>
    %22 = vector.extract_strided_slice %11 {offsets = [11, 0], sizes = [1, 128], strides = [1, 1]} : vector<16x128xf32> to vector<1x128xf32>
    %23 = tpu.concatenate %21, %22 in 0 : vector<1x128xf32>, vector<1x128xf32> -> vector<2x128xf32>
    %24 = vector.extract_strided_slice %11 {offsets = [4, 0], sizes = [1, 128], strides = [1, 1]} : vector<16x128xf32> to vector<1x128xf32>
    %25 = vector.extract_strided_slice %11 {offsets = [12, 0], sizes = [1, 128], strides = [1, 1]} : vector<16x128xf32> to vector<1x128xf32>
    %26 = tpu.concatenate %24, %25 in 0 : vector<1x128xf32>, vector<1x128xf32> -> vector<2x128xf32>
    %27 = vector.extract_strided_slice %11 {offsets = [5, 0], sizes = [1, 128], strides = [1, 1]} : vector<16x128xf32> to vector<1x128xf32>
    %28 = vector.extract_strided_slice %11 {offsets = [13, 0], sizes = [1, 128], strides = [1, 1]} : vector<16x128xf32> to vector<1x128xf32>
    %29 = tpu.concatenate %27, %28 in 0 : vector<1x128xf32>, vector<1x128xf32> -> vector<2x128xf32>
    %30 = vector.extract_strided_slice %11 {offsets = [6, 0], sizes = [1, 128], strides = [1, 1]} : vector<16x128xf32> to vector<1x128xf32>
    %31 = vector.extract_strided_slice %11 {offsets = [14, 0], sizes = [1, 128], strides = [1, 1]} : vector<16x128xf32> to vector<1x128xf32>
    %32 = tpu.concatenate %30, %31 in 0 : vector<1x128xf32>, vector<1x128xf32> -> vector<2x128xf32>
    %33 = vector.extract_strided_slice %11 {offsets = [7, 0], sizes = [1, 128], strides = [1, 1]} : vector<16x128xf32> to vector<1x128xf32>
    %34 = vector.extract_strided_slice %11 {offsets = [15, 0], sizes = [1, 128], strides = [1, 1]} : vector<16x128xf32> to vector<1x128xf32>
    %35 = tpu.concatenate %33, %34 in 0 : vector<1x128xf32>, vector<1x128xf32> -> vector<2x128xf32>
    %c0_5 = arith.constant 0 : index
    %c0_6 = arith.constant 0 : index
    %36 = vector.load %arg3[%c0_5, %c0_6] : memref<2x32xf32, #tpu.memory_space<vmem>>, vector<2x32xf32>
    %c0_7 = arith.constant 0 : index
    %c0_8 = arith.constant 0 : index
    %37 = vector.load %arg4[%c0_7, %c0_8] : memref<2x32xf32, #tpu.memory_space<vmem>>, vector<2x32xf32>
    %cst_9 = arith.constant dense<0.000000e+00> : vector<2x128xf32>
    %38 = tpu.matmul %36, %1, %cst_9 {dimension_numbers = #tpu.dot_dimension_numbers<[1], [0], [0], [1], [0, 0, 1, 1], [], []>} : vector<2x32xf32>, vector<32x128xf32>, vector<2x128xf32> -> vector<2x128xf32>
    %39 = arith.addf %14, %38 : vector<2x128xf32>
    %40 = arith.negf %39 : vector<2x128xf32>
    %41 = math.exp %40 : vector<2x128xf32>
    %cst_10 = arith.constant 1.000000e+00 : f32
    %42 = vector.broadcast %cst_10 : f32 to vector<2x128xf32>
    %43 = arith.addf %42, %41 : vector<2x128xf32>
    %44 = arith.divf %42, %43 : vector<2x128xf32>
    %45 = math.tanh %39 : vector<2x128xf32>
    %46 = vector.extract_strided_slice %44 {offsets = [0, 0], sizes = [2, 32], strides = [1, 1]} : vector<2x128xf32> to vector<2x32xf32>
    %47 = vector.extract_strided_slice %44 {offsets = [0, 32], sizes = [2, 32], strides = [1, 1]} : vector<2x128xf32> to vector<2x32xf32>
    %48 = vector.extract_strided_slice %45 {offsets = [0, 64], sizes = [2, 32], strides = [1, 1]} : vector<2x128xf32> to vector<2x32xf32>
    %49 = vector.extract_strided_slice %44 {offsets = [0, 96], sizes = [2, 32], strides = [1, 1]} : vector<2x128xf32> to vector<2x32xf32>
    %50 = arith.mulf %47, %37 : vector<2x32xf32>
    %51 = arith.mulf %46, %48 : vector<2x32xf32>
    %52 = arith.addf %50, %51 : vector<2x32xf32>
    %53 = math.tanh %52 : vector<2x32xf32>
    %54 = arith.mulf %49, %53 : vector<2x32xf32>
    %cst_11 = arith.constant dense<0.000000e+00> : vector<2x128xf32>
    %55 = tpu.matmul %54, %1, %cst_11 {dimension_numbers = #tpu.dot_dimension_numbers<[1], [0], [0], [1], [0, 0, 1, 1], [], []>} : vector<2x32xf32>, vector<32x128xf32>, vector<2x128xf32> -> vector<2x128xf32>
    %56 = arith.addf %17, %55 : vector<2x128xf32>
    %57 = arith.negf %56 : vector<2x128xf32>
    %58 = math.exp %57 : vector<2x128xf32>
    %cst_12 = arith.constant 1.000000e+00 : f32
    %59 = vector.broadcast %cst_12 : f32 to vector<2x128xf32>
    %60 = arith.addf %59, %58 : vector<2x128xf32>
    %61 = arith.divf %59, %60 : vector<2x128xf32>
    %62 = math.tanh %56 : vector<2x128xf32>
    %63 = vector.extract_strided_slice %61 {offsets = [0, 0], sizes = [2, 32], strides = [1, 1]} : vector<2x128xf32> to vector<2x32xf32>
    %64 = vector.extract_strided_slice %61 {offsets = [0, 32], sizes = [2, 32], strides = [1, 1]} : vector<2x128xf32> to vector<2x32xf32>
    %65 = vector.extract_strided_slice %62 {offsets = [0, 64], sizes = [2, 32], strides = [1, 1]} : vector<2x128xf32> to vector<2x32xf32>
    %66 = vector.extract_strided_slice %61 {offsets = [0, 96], sizes = [2, 32], strides = [1, 1]} : vector<2x128xf32> to vector<2x32xf32>
    %67 = arith.mulf %64, %52 : vector<2x32xf32>
    %68 = arith.mulf %63, %65 : vector<2x32xf32>
    %69 = arith.addf %67, %68 : vector<2x32xf32>
    %70 = math.tanh %69 : vector<2x32xf32>
    %71 = arith.mulf %66, %70 : vector<2x32xf32>
    %cst_13 = arith.constant dense<0.000000e+00> : vector<2x128xf32>
    %72 = tpu.matmul %71, %1, %cst_13 {dimension_numbers = #tpu.dot_dimension_numbers<[1], [0], [0], [1], [0, 0, 1, 1], [], []>} : vector<2x32xf32>, vector<32x128xf32>, vector<2x128xf32> -> vector<2x128xf32>
    %73 = arith.addf %20, %72 : vector<2x128xf32>
    %74 = arith.negf %73 : vector<2x128xf32>
    %75 = math.exp %74 : vector<2x128xf32>
    %cst_14 = arith.constant 1.000000e+00 : f32
    %76 = vector.broadcast %cst_14 : f32 to vector<2x128xf32>
    %77 = arith.addf %76, %75 : vector<2x128xf32>
    %78 = arith.divf %76, %77 : vector<2x128xf32>
    %79 = math.tanh %73 : vector<2x128xf32>
    %80 = vector.extract_strided_slice %78 {offsets = [0, 0], sizes = [2, 32], strides = [1, 1]} : vector<2x128xf32> to vector<2x32xf32>
    %81 = vector.extract_strided_slice %78 {offsets = [0, 32], sizes = [2, 32], strides = [1, 1]} : vector<2x128xf32> to vector<2x32xf32>
    %82 = vector.extract_strided_slice %79 {offsets = [0, 64], sizes = [2, 32], strides = [1, 1]} : vector<2x128xf32> to vector<2x32xf32>
    %83 = vector.extract_strided_slice %78 {offsets = [0, 96], sizes = [2, 32], strides = [1, 1]} : vector<2x128xf32> to vector<2x32xf32>
    %84 = arith.mulf %81, %69 : vector<2x32xf32>
    %85 = arith.mulf %80, %82 : vector<2x32xf32>
    %86 = arith.addf %84, %85 : vector<2x32xf32>
    %87 = math.tanh %86 : vector<2x32xf32>
    %88 = arith.mulf %83, %87 : vector<2x32xf32>
    %cst_15 = arith.constant dense<0.000000e+00> : vector<2x128xf32>
    %89 = tpu.matmul %88, %1, %cst_15 {dimension_numbers = #tpu.dot_dimension_numbers<[1], [0], [0], [1], [0, 0, 1, 1], [], []>} : vector<2x32xf32>, vector<32x128xf32>, vector<2x128xf32> -> vector<2x128xf32>
    %90 = arith.addf %23, %89 : vector<2x128xf32>
    %91 = arith.negf %90 : vector<2x128xf32>
    %92 = math.exp %91 : vector<2x128xf32>
    %cst_16 = arith.constant 1.000000e+00 : f32
    %93 = vector.broadcast %cst_16 : f32 to vector<2x128xf32>
    %94 = arith.addf %93, %92 : vector<2x128xf32>
    %95 = arith.divf %93, %94 : vector<2x128xf32>
    %96 = math.tanh %90 : vector<2x128xf32>
    %97 = vector.extract_strided_slice %95 {offsets = [0, 0], sizes = [2, 32], strides = [1, 1]} : vector<2x128xf32> to vector<2x32xf32>
    %98 = vector.extract_strided_slice %95 {offsets = [0, 32], sizes = [2, 32], strides = [1, 1]} : vector<2x128xf32> to vector<2x32xf32>
    %99 = vector.extract_strided_slice %96 {offsets = [0, 64], sizes = [2, 32], strides = [1, 1]} : vector<2x128xf32> to vector<2x32xf32>
    %100 = vector.extract_strided_slice %95 {offsets = [0, 96], sizes = [2, 32], strides = [1, 1]} : vector<2x128xf32> to vector<2x32xf32>
    %101 = arith.mulf %98, %86 : vector<2x32xf32>
    %102 = arith.mulf %97, %99 : vector<2x32xf32>
    %103 = arith.addf %101, %102 : vector<2x32xf32>
    %104 = math.tanh %103 : vector<2x32xf32>
    %105 = arith.mulf %100, %104 : vector<2x32xf32>
    %cst_17 = arith.constant dense<0.000000e+00> : vector<2x128xf32>
    %106 = tpu.matmul %105, %1, %cst_17 {dimension_numbers = #tpu.dot_dimension_numbers<[1], [0], [0], [1], [0, 0, 1, 1], [], []>} : vector<2x32xf32>, vector<32x128xf32>, vector<2x128xf32> -> vector<2x128xf32>
    %107 = arith.addf %26, %106 : vector<2x128xf32>
    %108 = arith.negf %107 : vector<2x128xf32>
    %109 = math.exp %108 : vector<2x128xf32>
    %cst_18 = arith.constant 1.000000e+00 : f32
    %110 = vector.broadcast %cst_18 : f32 to vector<2x128xf32>
    %111 = arith.addf %110, %109 : vector<2x128xf32>
    %112 = arith.divf %110, %111 : vector<2x128xf32>
    %113 = math.tanh %107 : vector<2x128xf32>
    %114 = vector.extract_strided_slice %112 {offsets = [0, 0], sizes = [2, 32], strides = [1, 1]} : vector<2x128xf32> to vector<2x32xf32>
    %115 = vector.extract_strided_slice %112 {offsets = [0, 32], sizes = [2, 32], strides = [1, 1]} : vector<2x128xf32> to vector<2x32xf32>
    %116 = vector.extract_strided_slice %113 {offsets = [0, 64], sizes = [2, 32], strides = [1, 1]} : vector<2x128xf32> to vector<2x32xf32>
    %117 = vector.extract_strided_slice %112 {offsets = [0, 96], sizes = [2, 32], strides = [1, 1]} : vector<2x128xf32> to vector<2x32xf32>
    %118 = arith.mulf %115, %103 : vector<2x32xf32>
    %119 = arith.mulf %114, %116 : vector<2x32xf32>
    %120 = arith.addf %118, %119 : vector<2x32xf32>
    %121 = math.tanh %120 : vector<2x32xf32>
    %122 = arith.mulf %117, %121 : vector<2x32xf32>
    %cst_19 = arith.constant dense<0.000000e+00> : vector<2x128xf32>
    %123 = tpu.matmul %122, %1, %cst_19 {dimension_numbers = #tpu.dot_dimension_numbers<[1], [0], [0], [1], [0, 0, 1, 1], [], []>} : vector<2x32xf32>, vector<32x128xf32>, vector<2x128xf32> -> vector<2x128xf32>
    %124 = arith.addf %29, %123 : vector<2x128xf32>
    %125 = arith.negf %124 : vector<2x128xf32>
    %126 = math.exp %125 : vector<2x128xf32>
    %cst_20 = arith.constant 1.000000e+00 : f32
    %127 = vector.broadcast %cst_20 : f32 to vector<2x128xf32>
    %128 = arith.addf %127, %126 : vector<2x128xf32>
    %129 = arith.divf %127, %128 : vector<2x128xf32>
    %130 = math.tanh %124 : vector<2x128xf32>
    %131 = vector.extract_strided_slice %129 {offsets = [0, 0], sizes = [2, 32], strides = [1, 1]} : vector<2x128xf32> to vector<2x32xf32>
    %132 = vector.extract_strided_slice %129 {offsets = [0, 32], sizes = [2, 32], strides = [1, 1]} : vector<2x128xf32> to vector<2x32xf32>
    %133 = vector.extract_strided_slice %130 {offsets = [0, 64], sizes = [2, 32], strides = [1, 1]} : vector<2x128xf32> to vector<2x32xf32>
    %134 = vector.extract_strided_slice %129 {offsets = [0, 96], sizes = [2, 32], strides = [1, 1]} : vector<2x128xf32> to vector<2x32xf32>
    %135 = arith.mulf %132, %120 : vector<2x32xf32>
    %136 = arith.mulf %131, %133 : vector<2x32xf32>
    %137 = arith.addf %135, %136 : vector<2x32xf32>
    %138 = math.tanh %137 : vector<2x32xf32>
    %139 = arith.mulf %134, %138 : vector<2x32xf32>
    %cst_21 = arith.constant dense<0.000000e+00> : vector<2x128xf32>
    %140 = tpu.matmul %139, %1, %cst_21 {dimension_numbers = #tpu.dot_dimension_numbers<[1], [0], [0], [1], [0, 0, 1, 1], [], []>} : vector<2x32xf32>, vector<32x128xf32>, vector<2x128xf32> -> vector<2x128xf32>
    %141 = arith.addf %32, %140 : vector<2x128xf32>
    %142 = arith.negf %141 : vector<2x128xf32>
    %143 = math.exp %142 : vector<2x128xf32>
    %cst_22 = arith.constant 1.000000e+00 : f32
    %144 = vector.broadcast %cst_22 : f32 to vector<2x128xf32>
    %145 = arith.addf %144, %143 : vector<2x128xf32>
    %146 = arith.divf %144, %145 : vector<2x128xf32>
    %147 = math.tanh %141 : vector<2x128xf32>
    %148 = vector.extract_strided_slice %146 {offsets = [0, 0], sizes = [2, 32], strides = [1, 1]} : vector<2x128xf32> to vector<2x32xf32>
    %149 = vector.extract_strided_slice %146 {offsets = [0, 32], sizes = [2, 32], strides = [1, 1]} : vector<2x128xf32> to vector<2x32xf32>
    %150 = vector.extract_strided_slice %147 {offsets = [0, 64], sizes = [2, 32], strides = [1, 1]} : vector<2x128xf32> to vector<2x32xf32>
    %151 = vector.extract_strided_slice %146 {offsets = [0, 96], sizes = [2, 32], strides = [1, 1]} : vector<2x128xf32> to vector<2x32xf32>
    %152 = arith.mulf %149, %137 : vector<2x32xf32>
    %153 = arith.mulf %148, %150 : vector<2x32xf32>
    %154 = arith.addf %152, %153 : vector<2x32xf32>
    %155 = math.tanh %154 : vector<2x32xf32>
    %156 = arith.mulf %151, %155 : vector<2x32xf32>
    %cst_23 = arith.constant dense<0.000000e+00> : vector<2x128xf32>
    %157 = tpu.matmul %156, %1, %cst_23 {dimension_numbers = #tpu.dot_dimension_numbers<[1], [0], [0], [1], [0, 0, 1, 1], [], []>} : vector<2x32xf32>, vector<32x128xf32>, vector<2x128xf32> -> vector<2x128xf32>
    %158 = arith.addf %35, %157 : vector<2x128xf32>
    %159 = arith.negf %158 : vector<2x128xf32>
    %160 = math.exp %159 : vector<2x128xf32>
    %cst_24 = arith.constant 1.000000e+00 : f32
    %161 = vector.broadcast %cst_24 : f32 to vector<2x128xf32>
    %162 = arith.addf %161, %160 : vector<2x128xf32>
    %163 = arith.divf %161, %162 : vector<2x128xf32>
    %164 = math.tanh %158 : vector<2x128xf32>
    %165 = vector.extract_strided_slice %163 {offsets = [0, 0], sizes = [2, 32], strides = [1, 1]} : vector<2x128xf32> to vector<2x32xf32>
    %166 = vector.extract_strided_slice %163 {offsets = [0, 32], sizes = [2, 32], strides = [1, 1]} : vector<2x128xf32> to vector<2x32xf32>
    %167 = vector.extract_strided_slice %164 {offsets = [0, 64], sizes = [2, 32], strides = [1, 1]} : vector<2x128xf32> to vector<2x32xf32>
    %168 = vector.extract_strided_slice %163 {offsets = [0, 96], sizes = [2, 32], strides = [1, 1]} : vector<2x128xf32> to vector<2x32xf32>
    %169 = arith.mulf %166, %154 : vector<2x32xf32>
    %170 = arith.mulf %165, %167 : vector<2x32xf32>
    %171 = arith.addf %169, %170 : vector<2x32xf32>
    %172 = math.tanh %171 : vector<2x32xf32>
    %173 = arith.mulf %168, %172 : vector<2x32xf32>
    %c0_25 = arith.constant 0 : index
    %c0_26 = arith.constant 0 : index
    %174 = vector.load %arg6[%c0_25, %c0_26] : memref<2x32xf32, #tpu.memory_space<vmem>>, vector<2x32xf32>
    tpu.vector_store %arg6[%c0_25, %c0_26], %173 {strides = array<i32>} : memref<2x32xf32, #tpu.memory_space<vmem>>, vector<2x32xf32>,
    %c0_27 = arith.constant 0 : index
    %c0_28 = arith.constant 0 : index
    %175 = vector.load %arg7[%c0_27, %c0_28] : memref<2x32xf32, #tpu.memory_space<vmem>>, vector<2x32xf32>
    tpu.vector_store %arg7[%c0_27, %c0_28], %171 {strides = array<i32>} : memref<2x32xf32, #tpu.memory_space<vmem>>, vector<2x32xf32>,
    %176 = vector.extract_strided_slice %54 {offsets = [0, 0], sizes = [1, 32], strides = [1, 1]} : vector<2x32xf32> to vector<1x32xf32>
    %177 = vector.extract_strided_slice %71 {offsets = [0, 0], sizes = [1, 32], strides = [1, 1]} : vector<2x32xf32> to vector<1x32xf32>
    %178 = vector.extract_strided_slice %88 {offsets = [0, 0], sizes = [1, 32], strides = [1, 1]} : vector<2x32xf32> to vector<1x32xf32>
    %179 = vector.extract_strided_slice %105 {offsets = [0, 0], sizes = [1, 32], strides = [1, 1]} : vector<2x32xf32> to vector<1x32xf32>
    %180 = vector.extract_strided_slice %122 {offsets = [0, 0], sizes = [1, 32], strides = [1, 1]} : vector<2x32xf32> to vector<1x32xf32>
    %181 = vector.extract_strided_slice %139 {offsets = [0, 0], sizes = [1, 32], strides = [1, 1]} : vector<2x32xf32> to vector<1x32xf32>
    %182 = vector.extract_strided_slice %156 {offsets = [0, 0], sizes = [1, 32], strides = [1, 1]} : vector<2x32xf32> to vector<1x32xf32>
    %183 = vector.extract_strided_slice %173 {offsets = [0, 0], sizes = [1, 32], strides = [1, 1]} : vector<2x32xf32> to vector<1x32xf32>
    %184 = vector.extract_strided_slice %54 {offsets = [1, 0], sizes = [1, 32], strides = [1, 1]} : vector<2x32xf32> to vector<1x32xf32>
    %185 = vector.extract_strided_slice %71 {offsets = [1, 0], sizes = [1, 32], strides = [1, 1]} : vector<2x32xf32> to vector<1x32xf32>
    %186 = vector.extract_strided_slice %88 {offsets = [1, 0], sizes = [1, 32], strides = [1, 1]} : vector<2x32xf32> to vector<1x32xf32>
    %187 = vector.extract_strided_slice %105 {offsets = [1, 0], sizes = [1, 32], strides = [1, 1]} : vector<2x32xf32> to vector<1x32xf32>
    %188 = vector.extract_strided_slice %122 {offsets = [1, 0], sizes = [1, 32], strides = [1, 1]} : vector<2x32xf32> to vector<1x32xf32>
    %189 = vector.extract_strided_slice %139 {offsets = [1, 0], sizes = [1, 32], strides = [1, 1]} : vector<2x32xf32> to vector<1x32xf32>
    %190 = vector.extract_strided_slice %156 {offsets = [1, 0], sizes = [1, 32], strides = [1, 1]} : vector<2x32xf32> to vector<1x32xf32>
    %191 = vector.extract_strided_slice %173 {offsets = [1, 0], sizes = [1, 32], strides = [1, 1]} : vector<2x32xf32> to vector<1x32xf32>
    %192 = tpu.concatenate %176, %177, %178, %179, %180, %181, %182, %183, %184, %185, %186, %187, %188, %189, %190, %191 in 0 : vector<1x32xf32>, vector<1x32xf32>, vector<1x32xf32>, vector<1x32xf32>, vector<1x32xf32>, vector<1x32xf32>, vector<1x32xf32>, vector<1x32xf32>, vector<1x32xf32>, vector<1x32xf32>, vector<1x32xf32>, vector<1x32xf32>, vector<1x32xf32>, vector<1x32xf32>, vector<1x32xf32>, vector<1x32xf32> -> vector<16x32xf32>
    %c0_29 = arith.constant 0 : index
    %c0_30 = arith.constant 0 : index
    %193 = vector.load %arg2[%c0_29, %c0_30] : memref<33x128xf32, #tpu.memory_space<vmem>>, vector<32x128xf32>
    %c32 = arith.constant 32 : index
    %c0_31 = arith.constant 0 : index
    %194 = vector.load %arg2[%c32, %c0_31] : memref<33x128xf32, #tpu.memory_space<vmem>>, vector<1x128xf32>
    %cst_32 = arith.constant dense<0.000000e+00> : vector<16x128xf32>
    %195 = tpu.matmul %192, %193, %cst_32 {dimension_numbers = #tpu.dot_dimension_numbers<[1], [0], [0], [1], [0, 0, 1, 1], [], []>} : vector<16x32xf32>, vector<32x128xf32>, vector<16x128xf32> -> vector<16x128xf32>
    %196 = vector.broadcast %194 : vector<1x128xf32> to vector<16x128xf32>
    %197 = arith.addf %195, %196 : vector<16x128xf32>
    %cst_33 = arith.constant dense<0xFF800000> : vector<16xf32>
    %198 = vector.multi_reduction <maximumf>, %197, %cst_33 [1] : vector<16x128xf32> to vector<16xf32>
    %199 = vector.shape_cast %198 : vector<16xf32> to vector<16x1xf32>
    %200 = vector.broadcast %199 : vector<16x1xf32> to vector<16x128xf32>
    %201 = arith.subf %197, %200 : vector<16x128xf32>
    %202 = math.exp %201 : vector<16x128xf32>
    %cst_34 = arith.constant dense<0.000000e+00> : vector<16xf32>
    %203 = vector.multi_reduction <add>, %202, %cst_34 [1] : vector<16x128xf32> to vector<16xf32>
    %204 = vector.shape_cast %203 : vector<16xf32> to vector<16x1xf32>
    %205 = math.log %204 : vector<16x1xf32>
    %206 = arith.addf %205, %199 : vector<16x1xf32>
    %207 = vector.broadcast %206 : vector<16x1xf32> to vector<16x128xf32>
    %208 = arith.subf %197, %207 : vector<16x128xf32>
    %c0_35 = arith.constant 0 : index
    %c0_36 = arith.constant 0 : index
    %209 = vector.load %arg5[%c0_35, %c0_36] : memref<16x128xf32, #tpu.memory_space<vmem>>, vector<16x128xf32>
    tpu.vector_store %arg5[%c0_35, %c0_36], %208 {strides = array<i32>} : memref<16x128xf32, #tpu.memory_space<vmem>>, vector<16x128xf32>,
    return
  }
}

</mosaic_0001>

<bundles_post_ra>
// kernel: lstm_lm_forward.1
= control target key start
LH: loop header
LB: loop body
LE: loop exit
PB: predicated region body
PF: predicated region fallthrough
CT: control target
= control target key end

     0   :  { %13 = vsyncpa [#allocation3], 0  ;;  %s1284_s0 = inlined_call_operand.vmem [shape: s32[16,1], index: 0, kind: input, shape index: {}]   ;;  %s1285_s1 = inlined_call_operand.hbm [shape: f32[161,128], index: 1, kind: input, shape index: {}]   ;;  %s1286_s2 = inlined_call_operand.hbm [shape: f32[33,128], index: 2, kind: input, shape index: {}]   ;;  %s1287_s3 = inlined_call_operand.vmem [shape: f32[2,32], index: 3, kind: input, shape index: {}]   ;;  %s1288_s4 = inlined_call_operand.vmem [shape: f32[2,32], index: 4, kind: input, shape index: {}]   ;;  %s1289_s5 = inlined_call_operand.hbm [shape: f32[16,128], index: 5, kind: output, shape index: {0}]   ;;  %s1290_s6 = inlined_call_operand.hbm [shape: f32[2,32], index: 6, kind: output, shape index: {1}]   ;;  %s1291_s7 = inlined_call_operand.hbm [shape: f32[2,32], index: 7, kind: output, shape index: {2}]  }
   0x1   :  { %14 = vsyncpa [#allocation6], 0 }
   0x2   :  { %15 = vsyncpa [#allocation4], 0 }
   0x3   :  { %16 = vsyncpa [#allocation9], 0  ;;  %s23_s26 = sshll.u32 %s1285_s1, 4  ;;  %s1076_s27 = smov [#allocation2]   ;;  %s24_s26 = int_to_ptr.hbm [resolvable:$true] %s23_s26 }
   0x4   :  { %s25_s28 = sshll.u32 %s1076_s27, 4  ;;  %s36_s8 = sshll.u32 %s1286_s2, 4  ;;  %s26_s28 = int_to_ptr.vmem [resolvable:$true] %s25_s28  ;;  %s37_s8 = int_to_ptr.hbm [resolvable:$true] %s36_s8 }
   0x5   :  { %s1077_s9 = smov 128   ;;  %s1078_s10 = smov 8  }
   0x6   :  { %31 = dma.hbm_to_vmem [thread:$0]  %s24_s26, 2688, %s26_s28, [#allocation3], %s1077_s9, %s1077_s9, %s1078_s10  }
   0x7   :  { %s1079_s11 = smov [#allocation5]  }
   0x8   :  { %s38_s12 = sshll.u32 %s1079_s11, 4  ;;  %s39_s12 = int_to_ptr.vmem [resolvable:$true] %s38_s12 }
   0x9   :  { %44 = dma.hbm_to_vmem [thread:$0]  %s37_s8, 640, %s39_s12, [#allocation6], %s1077_s9, %s1077_s9, %s1078_s10  }
   0xa   :  { %1068 = dma.done.wait [#allocation3], 2688  }
   0xb   :  { %1069 = vsyncadd [#allocation3], 4294964608 }
   0xc   :  { %1070 = dma.done.wait [#allocation6], 640  }
   0xd   :  { %1071 = vsyncadd [#allocation6], 4294966656  ;;  %v1080_v0 = vmov 0   ;;  %v78_v1 = vld [vmem:[%s1284_s0] sm:$0xff]  ;;  %v72_v2 = vld [vmem:[#allocation2 + $0x78] sm:$0xff]  ;;  %vm159_vm0 = vcmask 261120   ;;  %v80_v24 = vlaneseq }
   0xe   :  { %873 = vset.pattern.permute.xlu0 %v1080_v0  ;;  %95 = vmatpush.msra.mxu0 %v72_v2  ;;  %v71_v3 = vld [vmem:[#allocation2 + $0x70] sm:$0xff]  ;;  %v70_v4 = vld [vmem:[#allocation2 + $0x68] sm:$0xff]  ;;  %v69_v5 = vld [vmem:[#allocation2 + $0x60] sm:$0xff]  ;;  %v1081_v27 = vmov 1.0   ;;  %vm121_vm3 = vcmask 1040384   ;;  %s1083_s18 = smov 32  }
   0xf   :  { %83 = vperm.xlu0 %873, %v78_v1   ;;  %v79_v6 = vld [vmem:[%s1284_s0 + $0x8] sm:$0xff]  ;;  %v68_v7 = vld [vmem:[#allocation2 + $0x58] sm:$0xff]  ;;  %v67_v8 = vld [vmem:[#allocation2 + $0x50] sm:$0xff]  ;;  %v81_v25 = vand.u32 127, %v80_v24  ;;  %s1085_s19 = smov [#allocation8]   ;;  %s808_s23 = sshll.u32 %s1290_s6, 4  ;;  %s809_s23 = int_to_ptr.hbm [resolvable:$true] %s808_s23 }
  0x10   :  { %96 = vmatpush.msra.mxu0 %v71_v3  ;;  %v66_v9 = vld [vmem:[#allocation2 + $0x48] sm:$0xff]  ;;  %v65_v10 = vld [vmem:[#allocation2 + $0x40] sm:$0xff]  ;;  %v64_v11 = vld [vmem:[#allocation2 + $0x38] sm:$0xff]  ;;  %s806_s20 = sshll.u32 %s1085_s19, 4  ;;  %s1086_s24 = smov [#allocation10]   ;;  %s807_s20 = int_to_ptr.vmem [resolvable:$true] %s806_s20 }
  0x11   :  { %v63_v12 = vld [vmem:[#allocation2 + $0x30] sm:$0xff]  ;;  %v62_v13 = vld [vmem:[#allocation2 + $0x28] sm:$0xff]  ;;  %v61_v14 = vld [vmem:[#allocation2 + $0x20] sm:$0xff]  ;;  %s817_s25 = sshll.u32 %s1086_s24, 4  ;;  %s819_s28 = sshll.u32 %s1291_s7, 4  ;;  %s818_s25 = int_to_ptr.vmem [resolvable:$true] %s817_s25  ;;  %s820_s28 = int_to_ptr.hbm [resolvable:$true] %s819_s28 }
  0x12   :  { %97 = vmatpush.msra.mxu0 %v70_v4  ;;  %v60_v15 = vld [vmem:[#allocation2 + $0x18] sm:$0xff]  ;;  %v59_v16 = vld [vmem:[#allocation2 + $0x10] sm:$0xff]  ;;  %v58_v17 = vld [vmem:[#allocation2 + $0x8] sm:$0xff]  ;;  %s1087_s6 = smov [#allocation7]   ;;  %s794_s8 = sshll.u32 %s1289_s5, 4  ;;  %s795_s8 = int_to_ptr.hbm [resolvable:$true] %s794_s8 }
  0x13   :  { %v57_v18 = vld [vmem:[#allocation2] sm:$0xff]  ;;  %v1146_v19 = vld [vmem:[#allocation2 + $0x98] sm:$0xff]  ;;  %v1150_v20 = vld [vmem:[#allocation2 + $0x90] sm:$0xff]  ;;  %s792_s29 = sshll.u32 %s1087_s6, 4  ;;  %s793_s29 = int_to_ptr.vmem [resolvable:$true] %s792_s29 }
  0x14   :  { %98 = vmatpush.msra.mxu0 %v69_v5  ;;  %175 = vmatpush.msra.mxu1 %v1146_v19  ;;  %v1154_v21 = vld [vmem:[#allocation2 + $0x88] sm:$0xff]  ;;  %v1157_v22 = vld [vmem:[#allocation2 + $0x80] sm:$0xff] }
  0x15   :  { %242 = vmatpush.msra.mxu2 %v1146_v19  ;;  %305 = vmatpush.msra.mxu3 %v1146_v19  ;;  %v157_v23 = vld [vmem:[%s1287_s3] sm:$0x3]  ;;  %s1082_s3 = smov 64  }
  0x16   :  { %99 = vmatpush.msra.mxu0 %v68_v7  ;;  %176 = vmatpush.msra.mxu1 %v1150_v20  ;;  %v874_v30 = vld [vmem:[#allocation2 + $0xa0] ss:$0 sm:$0xff] }
  0x17   :  { %86 = vperm.xlu0 %873, %v79_v6   ;;  %243 = vmatpush.msra.mxu2 %v1150_v20  ;;  %v158_v59 = vld [vmem:[%s1288_s4] sm:$0x3]  ;;  %s1084_s4 = smov 96  }
  0x18   :  { %100 = vmatpush.msra.mxu0 %v67_v8  ;;  %306 = vmatpush.msra.mxu3 %v1150_v20 }
  0x19   :  { %177 = vmatpush.msra.mxu1 %v1154_v21  ;;  %244 = vmatpush.msra.mxu2 %v1154_v21 }
  0x1a   :  { %101 = vmatpush.msra.mxu0 %v66_v9  ;;  %307 = vmatpush.msra.mxu3 %v1154_v21 }
  0x1b   :  { %178 = vmatpush.msra.mxu1 %v1157_v22  ;;  %245 = vmatpush.msra.mxu2 %v1157_v22 }
  0x1c   :  { %102 = vmatpush.msra.mxu0 %v65_v10  ;;  %843 = vmatmul.msk.f32.vlgmr.msra.gmra.mxu1 %vm159_vm0, %v157_v23 }
  0x1d   :  { %308 = vmatpush.msra.mxu3 %v1157_v22  ;;  %368 = vmatpush.msrb.mxu1 %v1146_v19 }
  0x1e   :  { %103 = vmatpush.msra.mxu0 %v64_v11  ;;  %431 = vmatpush.msrb.mxu2 %v1146_v19 }
  0x1f   :  { %494 = vmatpush.msrb.mxu3 %v1146_v19  ;;  %369 = vmatpush.msrb.mxu1 %v1150_v20 }
  0x20   :  { %104 = vmatpush.msra.mxu0 %v63_v12  ;;  %432 = vmatpush.msrb.mxu2 %v1150_v20 }
  0x21   :  { %495 = vmatpush.msrb.mxu3 %v1150_v20  ;;  %370 = vmatpush.msrb.mxu1 %v1154_v21 }
  0x22   :  { %105 = vmatpush.msra.mxu0 %v62_v13  ;;  %433 = vmatpush.msrb.mxu2 %v1154_v21 }
  0x23   :  { %496 = vmatpush.msrb.mxu3 %v1154_v21  ;;  %371 = vmatpush.msrb.mxu1 %v1157_v22 }
  0x24   :  { %106 = vmatpush.msra.mxu0 %v61_v14  ;;  %434 = vmatpush.msrb.mxu2 %v1157_v22 }
  0x25   :  { %497 = vmatpush.msrb.mxu3 %v1157_v22  ;;  %557 = vmatpush.msra.mxu1 %v1146_v19 }
  0x26   :  { %107 = vmatpush.msra.mxu0 %v60_v15 }
  0x27   :  { %558 = vmatpush.msra.mxu1 %v1150_v20 }
  0x28   :  { %108 = vmatpush.msra.mxu0 %v59_v16 }
  0x29   :  { %559 = vmatpush.msra.mxu1 %v1154_v21 }
  0x2a   :  { %109 = vmatpush.msra.mxu0 %v58_v17 }
  0x2b   :  { %560 = vmatpush.msra.mxu1 %v1157_v22 }
  0x2c   :  { %110 = vmatpush.msra.mxu0 %v57_v18 }
  0x81   :  { %v84_v26 = vpop.permute.xlu0 %83 }
  0x82   :  { %vm88_vm1 = vcmp.eq.s32.totalorder %v81_v25, %v84_v26 }
  0x83   :  { %841 = vmatmul.msk.f32.vlgmr.msra.gmra.mxu0 %vm88_vm1, %v1081_v27  ;;  %vm706_vm1 = vcmask 1041408  }
  0x89   :  { %v87_v28 = vpop.permute.xlu0 %86 }
  0x8a   :  { %vm89_vm2 = vcmp.eq.s32.totalorder %v81_v25, %v87_v28 }
  0x8b   :  { %842 = vmatmul.msk.f32.gmra.mxu0 %vm89_vm2, %v1081_v27 }
  0x99   :  { %v180_v41 = vpop.f32.mrf.mxu1 }
 0x100   :  { %v112_v29 = vpop.f32.mrf.mxu0 }
 0x101   :  { %v113_v31 = vadd.f32 %v874_v30, %v112_v29 }
 0x103   :  { %v124_v34 = vrot.slane %v113_v31, 1  ;;  %v127_v35 = vrot.slane %v113_v31, 2  ;;  %v132_v36 = vrot.slane %v113_v31, 3  ;;  %v137_v37 = vrot.slane %v113_v31, 4 }
 0x104   :  { %v142_v38 = vrot.slane %v113_v31, 5  ;;  %v147_v39 = vrot.slane %v113_v31, 6  ;;  %v152_v52 = vrot.slane %v113_v31, 7 }
 0x108   :  { %v115_v32 = vpop.f32.mrf.mxu0 }
 0x109   :  { %v116_v33 = vadd.f32 %v874_v30, %v115_v32 }
 0x10b   :  { %v119_v40 = vrot.slane %v116_v33, 7  ;;  %v126_v42 = vsel %vm121_vm3, %v124_v34, %v116_v33  ;;  %v129_v43 = vrot.slane %v116_v33, 1  ;;  %v134_v44 = vrot.slane %v116_v33, 2 }
 0x10c   :  { %v139_v45 = vrot.slane %v116_v33, 3  ;;  %v144_v46 = vrot.slane %v116_v33, 4  ;;  %v149_v47 = vrot.slane %v116_v33, 5  ;;  %v154_v48 = vrot.slane %v116_v33, 6 }
 0x10d   :  { %v122_v49 = vsel %vm121_vm3, %v113_v31, %v119_v40  ;;  %v1189_v50 = vsel %vm121_vm3, %v127_v35, %v129_v43  ;;  %v1192_v51 = vsel %vm121_vm3, %v132_v36, %v134_v44 }
 0x10e   :  { %v183_v53 = vadd.f32 %v180_v41, %v122_v49  ;;  %v1195_v54 = vsel %vm121_vm3, %v137_v37, %v139_v45  ;;  %v1198_v55 = vsel %vm121_vm3, %v142_v38, %v144_v46  ;;  %v1201_v56 = vsel %vm121_vm3, %v147_v39, %v149_v47 }
 0x10f   :  { %v1204_v57 = vsel %vm121_vm3, %v152_v52, %v154_v48 }
 0x110   :  { %876 = vtanh.f32 %v183_v53  ;;  %v844_v60 = vmul.f32 -1.442695, %v183_v53 }
 0x112   :  { %878 = vpow2.f32 %v844_v60 }
 0x116   :  { %v877_v58 = vpop.eup %876 }
 0x117   :  { %210 = vrot.lane.b32.xlu1 %v877_v58, %s1082_s3 }
 0x118   :  { %v879_v61 = vpop.eup %878 }
 0x119   :  { %v187_v62 = vadd.f32 1.0, %v879_v61 }
 0x11b   :  { %880 = vrcp.f32 %v187_v62  ;;  %v199_v4 = vand.u32 2147483648, %v187_v62  ;;  %vm193_vm5 = vweird.f32 %v187_v62  ;;  %v197_v5 = vand.u32 2147483647, %v187_v62 }
 0x11d   :  { %v200_v7 = vor.u32 1.1754944e-38, %v199_v4  ;;  %vm198_vm7 = vcmp.eq.f32.partialorder %v197_v5, 8.507059e+37 }
 0x11f   :  { %205 = vrot.lane.b32.xlu1 %v158_v59, %s1083_s18 }
 0x121   :  { %v881_v63 = vpop.eup %880 }
 0x122   :  { %v189_v0 = vmul.f32 %v881_v63, %v187_v62  ;;  %vm194_vm4 = vweird.f32 %v881_v63 }
 0x123   :  { %vm195_vm6 = vmor %vm193_vm5, %vm194_vm4 }
 0x124   :  { %v190_v1 = vsub.f32 1.0, %v189_v0 }
 0x126   :  { %v191_v2 = vmul.f32 %v881_v63, %v190_v1 }
 0x128   :  { %v192_v3 = vadd.f32 %v881_v63, %v191_v2 }
 0x12a   :  { %v196_v6 = vsel %vm195_vm6, %v881_v63, %v192_v3  ;;  %vm708_vm6 = vcmask 1042432  }
 0x12b   :  { %v201_v9 = vsel %vm198_vm7, %v200_v7, %v196_v6 }
 0x189   :  { %v211_v8 = vpop.permute.xlu1 %210 }
 0x18a   :  { %v213_v10 = vmul.f32 %v211_v8, %v201_v9 }
 0x18c   :  { %215 = vrot.lane.b32.xlu2 %v213_v10, %s1083_s18 }
 0x191   :  { %v206_v11 = vpop.permute.xlu1 %205 }
 0x192   :  { %v208_v12 = vmul.f32 %v206_v11, %v201_v9 }
 0x1e6   :  { %v216_v13 = vpop.permute.xlu2 %215 }
 0x1e7   :  { %v218_v14 = vadd.f32 %v216_v13, %v208_v12 }
 0x1e9   :  { %882 = vtanh.f32 %v218_v14 }
 0x1ef   :  { %v883_v15 = vpop.eup %882 }
 0x1f0   :  { %221 = vrot.lane.b32.xlu2 %v883_v15, %s1082_s3 }
 0x24a   :  { %v222_v16 = vpop.permute.xlu2 %221 }
 0x24b   :  { %v1213_v17 = vmul.f32 %v222_v16, %v201_v9 }
 0x24d   :  { %226 = vrot.lane.b32.xlu0 %v1213_v17, %s1083_s18  ;;  %v691_v10 = vrot.slane %v1213_v17, 1 }
 0x2bf   :  { %v227_v18 = vpop.permute.xlu0 %226 }
 0x2c0   :  { %845 = vmatmul.msk.f32.vlgmr.msra.gmra.mxu2 %vm159_vm0, %v227_v18 }
 0x2c1   :  { %620 = vmatpush.msra.mxu2 %v1146_v19 }
 0x2c3   :  { %621 = vmatpush.msra.mxu2 %v1150_v20 }
 0x2c5   :  { %622 = vmatpush.msra.mxu2 %v1154_v21 }
 0x2c7   :  { %623 = vmatpush.msra.mxu2 %v1157_v22 }
 0x343   :  { %v247_v23 = vpop.f32.mrf.mxu2 }
 0x344   :  { %v250_v24 = vadd.f32 %v247_v23, %v126_v42 }
 0x346   :  { %884 = vtanh.f32 %v250_v24  ;;  %v846_v26 = vmul.f32 -1.442695, %v250_v24 }
 0x348   :  { %886 = vpow2.f32 %v846_v26 }
 0x34c   :  { %v885_v25 = vpop.eup %884 }
 0x34d   :  { %273 = vrot.lane.b32.xlu1 %v885_v25, %s1082_s3 }
 0x34e   :  { %v887_v27 = vpop.eup %886 }
 0x34f   :  { %v254_v28 = vadd.f32 1.0, %v887_v27 }
 0x351   :  { %888 = vrcp.f32 %v254_v28  ;;  %v266_v21 = vand.u32 2147483648, %v254_v28  ;;  %vm260_vm9 = vweird.f32 %v254_v28  ;;  %v264_v22 = vand.u32 2147483647, %v254_v28 }
 0x353   :  { %v267_v33 = vor.u32 1.1754944e-38, %v266_v21  ;;  %vm265_vm11 = vcmp.eq.f32.partialorder %v264_v22, 8.507059e+37 }
 0x357   :  { %v889_v29 = vpop.eup %888 }
 0x358   :  { %v256_v30 = vmul.f32 %v889_v29, %v254_v28  ;;  %vm261_vm8 = vweird.f32 %v889_v29 }
 0x359   :  { %vm262_vm10 = vmor %vm260_vm9, %vm261_vm8 }
 0x35a   :  { %v257_v19 = vsub.f32 1.0, %v256_v30 }
 0x35c   :  { %v258_v31 = vmul.f32 %v889_v29, %v257_v19 }
 0x35e   :  { %v259_v20 = vadd.f32 %v889_v29, %v258_v31 }
 0x360   :  { %v263_v32 = vsel %vm262_vm10, %v889_v29, %v259_v20 }
 0x361   :  { %v268_v35 = vsel %vm265_vm11, %v267_v33, %v263_v32  ;;  %vm710_vm11 = vcmask 1043456  }
 0x362   :  { %v271_v37 = vmul.f32 %v268_v35, %v218_v14 }
 0x3bf   :  { %v274_v34 = vpop.permute.xlu1 %273 }
 0x3c0   :  { %v276_v36 = vmul.f32 %v274_v34, %v268_v35 }
 0x3c2   :  { %278 = vrot.lane.b32.xlu2 %v276_v36, %s1083_s18 }
 0x41c   :  { %v279_v38 = vpop.permute.xlu2 %278 }
 0x41d   :  { %v281_v39 = vadd.f32 %v279_v38, %v271_v37 }
 0x41f   :  { %890 = vtanh.f32 %v281_v39 }
 0x425   :  { %v891_v40 = vpop.eup %890 }
 0x426   :  { %284 = vrot.lane.b32.xlu0 %v891_v40, %s1082_s3 }
 0x498   :  { %v285_v41 = vpop.permute.xlu0 %284 }
 0x499   :  { %v287_v42 = vmul.f32 %v285_v41, %v268_v35 }
 0x49b   :  { %289 = vrot.lane.b32.xlu1 %v287_v42, %s1083_s18  ;;  %v677_v7 = vrot.slane %v287_v42, 7  ;;  %v718_v14 = vsel %vm121_vm3, %v691_v10, %v287_v42 }
 0x49d   :  { %v705_v13 = vsel %vm121_vm3, %v1213_v17, %v677_v7 }
 0x50d   :  { %v290_v43 = vpop.permute.xlu1 %289 }
 0x50e   :  { %847 = vmatmul.msk.f32.vlgmr.msra.gmra.mxu3 %vm159_vm0, %v290_v43 }
 0x591   :  { %v310_v44 = vpop.f32.mrf.mxu3 }
 0x592   :  { %v313_v45 = vadd.f32 %v310_v44, %v1189_v50 }
 0x594   :  { %892 = vtanh.f32 %v313_v45  ;;  %v848_v47 = vmul.f32 -1.442695, %v313_v45 }
 0x596   :  { %894 = vpow2.f32 %v848_v47 }
 0x59a   :  { %v893_v46 = vpop.eup %892 }
 0x59b   :  { %336 = vrot.lane.b32.xlu2 %v893_v46, %s1082_s3 }
 0x59c   :  { %v895_v48 = vpop.eup %894 }
 0x59d   :  { %v317_v49 = vadd.f32 1.0, %v895_v48 }
 0x59f   :  { %896 = vrcp.f32 %v317_v49  ;;  %v329_v61 = vand.u32 2147483648, %v317_v49  ;;  %vm323_vm13 = vweird.f32 %v317_v49  ;;  %v327_v62 = vand.u32 2147483647, %v317_v49 }
 0x5a1   :  { %v330_v63 = vor.u32 1.1754944e-38, %v329_v61  ;;  %vm328_vm15 = vcmp.eq.f32.partialorder %v327_v62, 8.507059e+37 }
 0x5a5   :  { %v897_v52 = vpop.eup %896 }
 0x5a6   :  { %v319_v53 = vmul.f32 %v897_v52, %v317_v49  ;;  %vm324_vm12 = vweird.f32 %v897_v52 }
 0x5a7   :  { %vm325_vm14 = vmor %vm323_vm13, %vm324_vm12 }
 0x5a8   :  { %v320_v58 = vsub.f32 1.0, %v319_v53 }
 0x5aa   :  { %v321_v59 = vmul.f32 %v897_v52, %v320_v58 }
 0x5ac   :  { %v322_v60 = vadd.f32 %v897_v52, %v321_v59 }
 0x5ae   :  { %v326_v50 = vsel %vm325_vm14, %v897_v52, %v322_v60 }
 0x5af   :  { %v331_v1 = vsel %vm328_vm15, %v330_v63, %v326_v50 }
 0x5b0   :  { %v334_v3 = vmul.f32 %v331_v1, %v281_v39 }
 0x5f5   :  { %v337_v0 = vpop.permute.xlu2 %336 }
 0x5f6   :  { %v339_v2 = vmul.f32 %v337_v0, %v331_v1 }
 0x5f8   :  { %341 = vrot.lane.b32.xlu0 %v339_v2, %s1083_s18 }
 0x66a   :  { %v342_v4 = vpop.permute.xlu0 %341 }
 0x66b   :  { %v344_v5 = vadd.f32 %v342_v4, %v334_v3 }
 0x66d   :  { %898 = vtanh.f32 %v344_v5 }
 0x673   :  { %v899_v6 = vpop.eup %898 }
 0x674   :  { %347 = vrot.lane.b32.xlu1 %v899_v6, %s1082_s3 }
 0x6e6   :  { %v348_v8 = vpop.permute.xlu1 %347 }
 0x6e7   :  { %v350_v9 = vmul.f32 %v348_v8, %v331_v1 }
 0x6e9   :  { %v679_v11 = vrot.slane %v350_v9, 6  ;;  %v693_v12 = vrot.slane %v350_v9, 7  ;;  %352 = vrot.lane.b32.xlu2 %v350_v9, %s1083_s18 }
 0x6eb   :  { %v707_v15 = vsel %vm706_vm1, %v705_v13, %v679_v11  ;;  %v719_v16 = vsel %vm706_vm1, %v718_v14, %v693_v12  ;;  %vm712_vm1 = vcmask 1044480  }
 0x743   :  { %v353_v18 = vpop.permute.xlu2 %352 }
 0x744   :  { %849 = vmatmul.msk.f32.vlgmr.msrb.gmra.mxu1 %vm159_vm0, %v353_v18 }
 0x7c1   :  { %v373_v23 = vpop.f32.mrf.mxu1 }
 0x7c2   :  { %v376_v24 = vadd.f32 %v373_v23, %v1192_v51 }
 0x7c4   :  { %900 = vtanh.f32 %v376_v24  ;;  %v850_v26 = vmul.f32 -1.442695, %v376_v24 }
 0x7c6   :  { %902 = vpow2.f32 %v850_v26 }
 0x7ca   :  { %v901_v25 = vpop.eup %900 }
 0x7cb   :  { %399 = vrot.lane.b32.xlu0 %v901_v25, %s1082_s3 }
 0x7cc   :  { %v903_v27 = vpop.eup %902 }
 0x7cd   :  { %v380_v28 = vadd.f32 1.0, %v903_v27 }
 0x7cf   :  { %904 = vrcp.f32 %v380_v28  ;;  %v392_v20 = vand.u32 2147483648, %v380_v28  ;;  %vm386_vm3 = vweird.f32 %v380_v28  ;;  %v390_v21 = vand.u32 2147483647, %v380_v28 }
 0x7d1   :  { %v393_v22 = vor.u32 1.1754944e-38, %v392_v20  ;;  %vm391_vm5 = vcmp.eq.f32.partialorder %v390_v21, 8.507059e+37 }
 0x7d5   :  { %v905_v17 = vpop.eup %904 }
 0x7d6   :  { %v382_v29 = vmul.f32 %v905_v17, %v380_v28  ;;  %vm387_vm2 = vweird.f32 %v905_v17 }
 0x7d7   :  { %vm388_vm4 = vmor %vm386_vm3, %vm387_vm2 }
 0x7d8   :  { %v383_v30 = vsub.f32 1.0, %v382_v29 }
 0x7da   :  { %v384_v19 = vmul.f32 %v905_v17, %v383_v30 }
 0x7dc   :  { %v385_v31 = vadd.f32 %v905_v17, %v384_v19 }
 0x7de   :  { %v389_v51 = vsel %vm388_vm4, %v905_v17, %v385_v31 }
 0x7df   :  { %v394_v33 = vsel %vm391_vm5, %v393_v22, %v389_v51 }
 0x7e0   :  { %v397_v35 = vmul.f32 %v394_v33, %v344_v5 }
 0x83d   :  { %v400_v32 = vpop.permute.xlu0 %399 }
 0x83e   :  { %v402_v34 = vmul.f32 %v400_v32, %v394_v33 }
 0x840   :  { %404 = vrot.lane.b32.xlu1 %v402_v34, %s1083_s18 }
 0x8b2   :  { %v405_v36 = vpop.permute.xlu1 %404 }
 0x8b3   :  { %v407_v37 = vadd.f32 %v405_v36, %v397_v35 }
 0x8b5   :  { %906 = vtanh.f32 %v407_v37 }
 0x8bb   :  { %v907_v38 = vpop.eup %906 }
 0x8bc   :  { %410 = vrot.lane.b32.xlu2 %v907_v38, %s1082_s3 }
 0x916   :  { %v411_v39 = vpop.permute.xlu2 %410 }
 0x917   :  { %v413_v40 = vmul.f32 %v411_v39, %v394_v33 }
 0x919   :  { %v681_v41 = vrot.slane %v413_v40, 5  ;;  %v695_v42 = vrot.slane %v413_v40, 6  ;;  %415 = vrot.lane.b32.xlu0 %v413_v40, %s1083_s18 }
 0x91b   :  { %v709_v43 = vsel %vm708_vm6, %v707_v15, %v681_v41  ;;  %v720_v44 = vsel %vm708_vm6, %v719_v16, %v695_v42  ;;  %vm714_vm6 = vcmask 1045504  }
 0x98b   :  { %v416_v45 = vpop.permute.xlu0 %415 }
 0x98c   :  { %851 = vmatmul.msk.f32.vlgmr.msrb.gmra.mxu2 %vm159_vm0, %v416_v45 }
 0xa0f   :  { %v436_v46 = vpop.f32.mrf.mxu2 }
 0xa10   :  { %v439_v47 = vadd.f32 %v436_v46, %v1195_v54 }
 0xa12   :  { %908 = vtanh.f32 %v439_v47  ;;  %v852_v49 = vmul.f32 -1.442695, %v439_v47 }
 0xa14   :  { %910 = vpow2.f32 %v852_v49 }
 0xa18   :  { %v909_v48 = vpop.eup %908 }
 0xa19   :  { %462 = vrot.lane.b32.xlu1 %v909_v48, %s1082_s3 }
 0xa1a   :  { %v911_v52 = vpop.eup %910 }
 0xa1b   :  { %v443_v53 = vadd.f32 1.0, %v911_v52 }
 0xa1d   :  { %912 = vrcp.f32 %v443_v53  ;;  %v455_v50 = vand.u32 2147483648, %v443_v53  ;;  %vm449_vm8 = vweird.f32 %v443_v53  ;;  %v453_v63 = vand.u32 2147483647, %v443_v53 }
 0xa1f   :  { %v456_v0 = vor.u32 1.1754944e-38, %v455_v50  ;;  %vm454_vm10 = vcmp.eq.f32.partialorder %v453_v63, 8.507059e+37 }
 0xa23   :  { %v913_v58 = vpop.eup %912 }
 0xa24   :  { %v445_v59 = vmul.f32 %v913_v58, %v443_v53  ;;  %vm450_vm7 = vweird.f32 %v913_v58 }
 0xa25   :  { %vm451_vm9 = vmor %vm449_vm8, %vm450_vm7 }
 0xa26   :  { %v446_v60 = vsub.f32 1.0, %v445_v59 }
 0xa28   :  { %v447_v61 = vmul.f32 %v913_v58, %v446_v60 }
 0xa2a   :  { %v448_v62 = vadd.f32 %v913_v58, %v447_v61 }
 0xa2c   :  { %v452_v54 = vsel %vm451_vm9, %v913_v58, %v448_v62 }
 0xa2d   :  { %v457_v2 = vsel %vm454_vm10, %v456_v0, %v452_v54 }
 0xa2e   :  { %v460_v4 = vmul.f32 %v457_v2, %v407_v37 }
 0xa8b   :  { %v463_v1 = vpop.permute.xlu1 %462 }
 0xa8c   :  { %v465_v3 = vmul.f32 %v463_v1, %v457_v2 }
 0xa8e   :  { %467 = vrot.lane.b32.xlu2 %v465_v3, %s1083_s18 }
 0xae8   :  { %v468_v5 = vpop.permute.xlu2 %467 }
 0xae9   :  { %v470_v6 = vadd.f32 %v468_v5, %v460_v4 }
 0xaeb   :  { %914 = vtanh.f32 %v470_v6 }
 0xaf1   :  { %v915_v7 = vpop.eup %914 }
 0xaf2   :  { %473 = vrot.lane.b32.xlu0 %v915_v7, %s1082_s3 }
 0xb64   :  { %v474_v8 = vpop.permute.xlu0 %473 }
 0xb65   :  { %v476_v9 = vmul.f32 %v474_v8, %v457_v2 }
 0xb67   :  { %v683_v10 = vrot.slane %v476_v9, 4  ;;  %v697_v11 = vrot.slane %v476_v9, 5  ;;  %478 = vrot.lane.b32.xlu1 %v476_v9, %s1083_s18 }
 0xb69   :  { %v711_v12 = vsel %vm710_vm11, %v709_v43, %v683_v10  ;;  %v721_v13 = vsel %vm710_vm11, %v720_v44, %v697_v11  ;;  %vm716_vm11 = vcmask 1046528  }
 0xbd9   :  { %v479_v14 = vpop.permute.xlu1 %478 }
 0xbda   :  { %853 = vmatmul.msk.f32.vlgmr.msrb.gmra.mxu3 %vm159_vm0, %v479_v14 }
 0xc5d   :  { %v499_v15 = vpop.f32.mrf.mxu3 }
 0xc5e   :  { %v502_v16 = vadd.f32 %v499_v15, %v1198_v55 }
 0xc60   :  { %916 = vtanh.f32 %v502_v16  ;;  %v854_v23 = vmul.f32 -1.442695, %v502_v16 }
 0xc62   :  { %918 = vpow2.f32 %v854_v23 }
 0xc66   :  { %v917_v18 = vpop.eup %916 }
 0xc67   :  { %525 = vrot.lane.b32.xlu2 %v917_v18, %s1082_s3 }
 0xc68   :  { %v919_v24 = vpop.eup %918 }
 0xc69   :  { %v506_v25 = vadd.f32 1.0, %v919_v24 }
 0xc6b   :  { %920 = vrcp.f32 %v506_v25  ;;  %v518_v30 = vand.u32 2147483648, %v506_v25  ;;  %vm512_vm13 = vweird.f32 %v506_v25  ;;  %v516_v19 = vand.u32 2147483647, %v506_v25 }
 0xc6d   :  { %v519_v31 = vor.u32 1.1754944e-38, %v518_v30  ;;  %vm517_vm15 = vcmp.eq.f32.partialorder %v516_v19, 8.507059e+37 }
 0xc71   :  { %v921_v26 = vpop.eup %920 }
 0xc72   :  { %v508_v27 = vmul.f32 %v921_v26, %v506_v25  ;;  %vm513_vm12 = vweird.f32 %v921_v26 }
 0xc73   :  { %vm514_vm14 = vmor %vm512_vm13, %vm513_vm12 }
 0xc74   :  { %v509_v28 = vsub.f32 1.0, %v508_v27 }
 0xc76   :  { %v510_v17 = vmul.f32 %v921_v26, %v509_v28 }
 0xc78   :  { %v511_v29 = vadd.f32 %v921_v26, %v510_v17 }
 0xc7a   :  { %v515_v55 = vsel %vm514_vm14, %v921_v26, %v511_v29 }
 0xc7b   :  { %v520_v21 = vsel %vm517_vm15, %v519_v31, %v515_v55 }
 0xc7c   :  { %v523_v22 = vmul.f32 %v520_v21, %v470_v6 }
 0xcc1   :  { %v526_v20 = vpop.permute.xlu2 %525 }
 0xcc2   :  { %v528_v51 = vmul.f32 %v526_v20, %v520_v21 }
 0xcc4   :  { %530 = vrot.lane.b32.xlu0 %v528_v51, %s1083_s18 }
 0xd36   :  { %v531_v32 = vpop.permute.xlu0 %530 }
 0xd37   :  { %v533_v33 = vadd.f32 %v531_v32, %v523_v22 }
 0xd39   :  { %922 = vtanh.f32 %v533_v33 }
 0xd3f   :  { %v923_v34 = vpop.eup %922 }
 0xd40   :  { %536 = vrot.lane.b32.xlu1 %v923_v34, %s1082_s3 }
 0xdb2   :  { %v537_v35 = vpop.permute.xlu1 %536 }
 0xdb3   :  { %v539_v36 = vmul.f32 %v537_v35, %v520_v21  ;;  %v728_v35 = vld [vmem:[#allocation5 + $0x18] sm:$0xff] }
 0xdb4   :  { %753 = vmatpush.msra.mxu3 %v728_v35 }
 0xdb5   :  { %v685_v37 = vrot.slane %v539_v36, 3  ;;  %v699_v38 = vrot.slane %v539_v36, 4  ;;  %541 = vrot.lane.b32.xlu2 %v539_v36, %s1083_s18  ;;  %v727_v36 = vld [vmem:[#allocation5 + $0x10] sm:$0xff] }
 0xdb6   :  { %754 = vmatpush.msra.mxu3 %v727_v36 }
 0xdb7   :  { %v713_v39 = vsel %vm712_vm1, %v711_v12, %v685_v37  ;;  %v722_v40 = vsel %vm712_vm1, %v721_v13, %v699_v38  ;;  %v726_v37 = vld [vmem:[#allocation5 + $0x8] sm:$0xff]  ;;  %v725_v38 = vld [vmem:[#allocation5] sm:$0xff] }
 0xdb8   :  { %755 = vmatpush.msra.mxu3 %v726_v37 }
 0xdba   :  { %756 = vmatpush.msra.mxu3 %v725_v38 }
 0xe0f   :  { %v542_v41 = vpop.permute.xlu2 %541 }
 0xe10   :  { %855 = vmatmul.msk.f32.vlgmr.msra.gmra.mxu1 %vm159_vm0, %v542_v41  ;;  %v875_v41 = vld [vmem:[#allocation5 + $0x20] ss:$0 sm:$0xff] }
 0xe8d   :  { %v562_v42 = vpop.f32.mrf.mxu1 }
 0xe8e   :  { %v565_v43 = vadd.f32 %v562_v42, %v1201_v56 }
 0xe90   :  { %924 = vtanh.f32 %v565_v43  ;;  %v856_v45 = vmul.f32 -1.442695, %v565_v43 }
 0xe92   :  { %926 = vpow2.f32 %v856_v45 }
 0xe96   :  { %v925_v44 = vpop.eup %924 }
 0xe97   :  { %588 = vrot.lane.b32.xlu0 %v925_v44, %s1082_s3 }
 0xe98   :  { %v927_v46 = vpop.eup %926 }
 0xe99   :  { %v569_v47 = vadd.f32 1.0, %v927_v46 }
 0xe9b   :  { %928 = vrcp.f32 %v569_v47  ;;  %v581_v59 = vand.u32 2147483648, %v569_v47  ;;  %vm575_vm3 = vweird.f32 %v569_v47  ;;  %v579_v60 = vand.u32 2147483647, %v569_v47 }
 0xe9d   :  { %v582_v61 = vor.u32 1.1754944e-38, %v581_v59  ;;  %vm580_vm5 = vcmp.eq.f32.partialorder %v579_v60, 8.507059e+37 }
 0xea1   :  { %v929_v48 = vpop.eup %928 }
 0xea2   :  { %v571_v49 = vmul.f32 %v929_v48, %v569_v47  ;;  %vm576_vm2 = vweird.f32 %v929_v48 }
 0xea3   :  { %vm577_vm4 = vmor %vm575_vm3, %vm576_vm2 }
 0xea4   :  { %v572_v52 = vsub.f32 1.0, %v571_v49 }
 0xea6   :  { %v573_v53 = vmul.f32 %v929_v48, %v572_v52 }
 0xea8   :  { %v574_v58 = vadd.f32 %v929_v48, %v573_v53 }
 0xeaa   :  { %v578_v56 = vsel %vm577_vm4, %v929_v48, %v574_v58 }
 0xeab   :  { %v583_v50 = vsel %vm580_vm5, %v582_v61, %v578_v56 }
 0xeac   :  { %v586_v54 = vmul.f32 %v583_v50, %v533_v33 }
 0xf09   :  { %v589_v62 = vpop.permute.xlu0 %588 }
 0xf0a   :  { %v591_v63 = vmul.f32 %v589_v62, %v583_v50 }
 0xf0c   :  { %593 = vrot.lane.b32.xlu1 %v591_v63, %s1083_s18 }
 0xf7e   :  { %v594_v0 = vpop.permute.xlu1 %593 }
 0xf7f   :  { %v596_v1 = vadd.f32 %v594_v0, %v586_v54 }
 0xf81   :  { %930 = vtanh.f32 %v596_v1 }
 0xf87   :  { %v931_v2 = vpop.eup %930 }
 0xf88   :  { %599 = vrot.lane.b32.xlu2 %v931_v2, %s1082_s3 }
 0xfe2   :  { %v600_v3 = vpop.permute.xlu2 %599 }
 0xfe3   :  { %v602_v4 = vmul.f32 %v600_v3, %v583_v50 }
 0xfe5   :  { %v687_v5 = vrot.slane %v602_v4, 2  ;;  %v701_v6 = vrot.slane %v602_v4, 3  ;;  %604 = vrot.lane.b32.xlu0 %v602_v4, %s1083_s18 }
 0xfe7   :  { %v715_v7 = vsel %vm714_vm6, %v713_v39, %v687_v5  ;;  %v723_v8 = vsel %vm714_vm6, %v722_v40, %v701_v6 }
0x1057   :  { %v605_v9 = vpop.permute.xlu0 %604 }
0x1058   :  { %857 = vmatmul.msk.f32.vlgmr.msra.gmra.mxu2 %vm159_vm0, %v605_v9 }
0x10db   :  { %v625_v10 = vpop.f32.mrf.mxu2 }
0x10dc   :  { %v628_v11 = vadd.f32 %v625_v10, %v1204_v57 }
0x10de   :  { %932 = vtanh.f32 %v628_v11  ;;  %v858_v13 = vmul.f32 -1.442695, %v628_v11 }
0x10e0   :  { %934 = vpow2.f32 %v858_v13 }
0x10e4   :  { %v933_v12 = vpop.eup %932 }
0x10e5   :  { %651 = vrot.lane.b32.xlu1 %v933_v12, %s1082_s3 }
0x10e6   :  { %v935_v14 = vpop.eup %934 }
0x10e7   :  { %v632_v15 = vadd.f32 1.0, %v935_v14 }
0x10e9   :  { %936 = vrcp.f32 %v632_v15  ;;  %v644_v26 = vand.u32 2147483648, %v632_v15  ;;  %vm638_vm8 = vweird.f32 %v632_v15  ;;  %v642_v27 = vand.u32 2147483647, %v632_v15 }
0x10eb   :  { %v645_v28 = vor.u32 1.1754944e-38, %v644_v26  ;;  %vm643_vm10 = vcmp.eq.f32.partialorder %v642_v27, 8.507059e+37 }
0x10ef   :  { %v937_v16 = vpop.eup %936 }
0x10f0   :  { %v634_v18 = vmul.f32 %v937_v16, %v632_v15  ;;  %vm639_vm7 = vweird.f32 %v937_v16 }
0x10f1   :  { %vm640_vm9 = vmor %vm638_vm8, %vm639_vm7 }
0x10f2   :  { %v635_v23 = vsub.f32 1.0, %v634_v18 }
0x10f4   :  { %v636_v24 = vmul.f32 %v937_v16, %v635_v23 }
0x10f6   :  { %v637_v25 = vadd.f32 %v937_v16, %v636_v24 }
0x10f8   :  { %v641_v57 = vsel %vm640_vm9, %v937_v16, %v637_v25 }
0x10f9   :  { %v646_v29 = vsel %vm643_vm10, %v645_v28, %v641_v57 }
0x10fa   :  { %v649_v19 = vmul.f32 %v646_v29, %v596_v1 }
0x1157   :  { %v652_v17 = vpop.permute.xlu1 %651 }
0x1158   :  { %v654_v30 = vmul.f32 %v652_v17, %v646_v29 }
0x115a   :  { %656 = vrot.lane.b32.xlu2 %v654_v30, %s1083_s18 }
0x11b4   :  { %v657_v55 = vpop.permute.xlu2 %656 }
0x11b5   :  { %v659_v31 = vadd.f32 %v657_v55, %v649_v19 }
0x11b7   :  { %938 = vtanh.f32 %v659_v31 }
0x11bd   :  { %v939_v20 = vpop.eup %938 }
0x11be   :  { %662 = vrot.lane.b32.xlu0 %v939_v20, %s1082_s3 }
0x1230   :  { %v663_v21 = vpop.permute.xlu0 %662 }
0x1231   :  { %v665_v51 = vmul.f32 %v663_v21, %v646_v29 }
0x1233   :  { %v689_v22 = vrot.slane %v665_v51, 1  ;;  %v703_v32 = vrot.slane %v665_v51, 2 }
0x1235   :  { %v717_v33 = vsel %vm716_vm11, %v715_v7, %v689_v22  ;;  %v724_v34 = vsel %vm716_vm11, %v723_v8, %v703_v32 }
0x1236   :  { %733 = vrot.lane.b32.xlu1 %v717_v33, %s1083_s18  ;;  %735 = vrot.lane.b32.xlu2 %v724_v34, %s1083_s18 }
0x1290   :  { %v736_v40 = vpop.permute.xlu2 %735 }
0x12a8   :  { %v734_v39 = vpop.permute.xlu1 %733 }
0x12a9   :  { %859 = vmatmul.msk.f32.vlgmr.msra.gmra.mxu3 %vm159_vm0, %v734_v39 }
0x12b1   :  { %860 = vmatmul.msk.f32.gmra.mxu3 %vm159_vm0, %v736_v40  ;;  %vm670_vm0 = vcmask 254976  }
0x132c   :  { %v758_v42 = vpop.f32.mrf.mxu3 }
0x132d   :  { %v759_v43 = vadd.f32 %v875_v41, %v758_v42 }
0x132f   :  { %764 = vmax.xlane.f32.xlu0 %v759_v43 }
0x1334   :  { %v761_v44 = vpop.f32.mrf.mxu3 }
0x1335   :  { %v762_v45 = vadd.f32 %v875_v41, %v761_v44 }
0x1337   :  { %766 = vmax.xlane.f32.xlu1 %v762_v45 }
0x1343   :  { %667 = vrot.lane.b32.xlu0 %v665_v51, %s1083_s18 }
0x1350   :  { %673 = vrot.lane.b32.xlu1 %v659_v31, %s1084_s4 }
0x13a2   :  { %v765_v46 = vpop.xlane.xlu0 %764 }
0x13a3   :  { %v768_v47 = vsub.f32 %v759_v43, %v765_v46 }
0x13a5   :  { %v770_v48 = vmul.f32 1.442695, %v768_v47 }
0x13a7   :  { %940 = vpow2.f32 %v770_v48 }
0x13aa   :  { %v767_v49 = vpop.xlane.xlu1 %766 }
0x13ab   :  { %v769_v52 = vsub.f32 %v762_v45, %v767_v49 }
0x13ad   :  { %v941_v53 = vpop.eup %940  ;;  %v772_v58 = vmul.f32 1.442695, %v769_v52 }
0x13ae   :  { %774 = vadd.xlane.f32.xlu2 %v941_v53 }
0x13af   :  { %942 = vpow2.f32 %v772_v58 }
0x13b5   :  { %v943_v59 = vpop.eup %942  ;;  %v668_v60 = vpop.permute.xlu0 %667 }
0x13b6   :  { %671 = vst.msk [vmem:[#allocation8] sm:$0x3] %vm670_vm0, %v668_v60  ;;  %776 = vadd.xlane.f32.xlu2 %v943_v59 }
0x13b7   :  { %811 = dma.vmem_to_hbm [thread:$0]  %s807_s20, 32, %s809_s23, [#allocation9]  }
0x13c2   :  { %v674_v56 = vpop.permute.xlu1 %673 }
0x13c3   :  { %676 = vst.msk [vmem:[#allocation10] sm:$0x3] %vm670_vm0, %v674_v56 }
0x13c4   :  { %822 = dma.vmem_to_hbm [thread:$0]  %s818_s25, 32, %s820_s28, [#allocation9]  }
0x1421   :  { %v775_v61 = vpop.xlane.xlu2 %774 }
0x1422   :  { %944 = vlog2.f32 %v775_v61 }
0x1428   :  { %v945_v62 = vpop.eup %944 }
0x1429   :  { %v779_v50 = vmul.f32 0.6931472, %v945_v62  ;;  %v777_v63 = vpop.xlane.xlu2 %776 }
0x142a   :  { %946 = vlog2.f32 %v777_v63 }
0x142b   :  { %v782_v54 = vadd.f32 %v779_v50, %v765_v46 }
0x142d   :  { %v784_v0 = vsub.f32 %v759_v43, %v782_v54 }
0x142f   :  { %786 = vst [vmem:[#allocation7] sm:$0xff] %v784_v0 }
0x1430   :  { %v947_v1 = vpop.eup %946 }
0x1431   :  { %v781_v2 = vmul.f32 0.6931472, %v947_v1 }
0x1433   :  { %v783_v3 = vadd.f32 %v781_v2, %v767_v49 }
0x1435   :  { %v785_v4 = vsub.f32 %v762_v45, %v783_v3 }
0x1437   :  { %787 = vst [vmem:[#allocation7 + $0x8] sm:$0xff] %v785_v4 }
0x1438   :  { %800 = dma.vmem_to_hbm [thread:$0]  %s793_s29, 256, %s795_s8, [#allocation4], %s1077_s9, %s1077_s9, %s1078_s10  }
0x1439   :  { %1072 = dma.done.wait [#allocation4], 256  }
0x143a   :  { %1073 = vsyncadd [#allocation4], 4294967040 }
0x143b   :  { %1074 = dma.done.wait [#allocation9], 64  }
0x143c   :  { %1075 = vsyncadd [#allocation9], 4294967232 }
0x143d   :  { %835 = vsyncpa [#allocation3], 1 }
0x143e   :  { %836 = vsyncpa [#allocation6], 1 }
0x143f   :  { %837 = vsyncpa [#allocation4], 1 }
0x1440   :  { %838 = vsyncpa [#allocation9], 1 }

</bundles_post_ra>
